<compile_context>
chip_gen: v6e
topology: v6e:2x2x1
jax: 0.10.0
libtpu: 0.0.40
codegen_flags: <defaults>
</compile_context>

<pallas_src>
import functools
import math

import jax
import jax.numpy as jnp
from jax.experimental import pallas as pl
from jax.experimental.pallas import tpu as pltpu


def _round_up(n, m):
    return ((n + m - 1) // m) * m


# Conservative per-kernel VMEM working-set budget: leaves headroom inside
# v7x's 64 MiB physical VMEM and trivially fits v5e/v6e's 128 MiB.
_VMEM_BUDGET = 40 * 1024 * 1024


def _vmem_estimate(B, D, tile):
    x_bytes = 2 * B * D * 2            # resident normalized X (bf16, 2 buffers)
    t_bytes = 2 * B * 4                # resident labels (i32)
    p_bytes = 2 * tile * D * 2         # double-buffered bf16 proxy tile
    inter = 6 * B * tile * 4           # live (B, tile) f32 intermediates
    return x_bytes + t_bytes + p_bytes + inter


def _l2_normalize(v):
    # torch l2_norm: x / sqrt(sum(x^2, dim=1) + 1e-12), computed in f32.
    v = v.astype(jnp.float32)
    return v * jax.lax.rsqrt(jnp.sum(v * v, axis=1, keepdims=True) + 1e-12)


def proxy_anchor_kernel(x_ref, p_ref, t_ref, out_ref, *,
                        alpha, mrg, nb_classes, c_tile):
    # x_ref : (B, D)      bf16 VMEM (l2-normalized, resident across the grid)
    # p_ref : (c_tile, D) bf16 VMEM (l2-normalized, one proxy tile per step)
    # t_ref : (B, 1)      i32 VMEM  (resident)
    # out_ref: (1, 3)     f32 SMEM  per-tile partials
    #          [pos_log_sum, neg_log_sum, n_valid]
    j = pl.program_id(0)

    xn = x_ref[...]                     # (B, c_tile? no: B, D) bf16
    pn = p_ref[...]                     # (c_tile, D) bf16
    t = t_ref[...]                      # (B, 1) i32

    # Cosine similarities on the MXU: bf16 inputs, f32 accumulation, contracting
    # D of both operands directly (no proxy-tile transpose materialization).
    cos = jax.lax.dot_general(
        xn, pn,
        dimension_numbers=(((1,), (1,)), ((), ())),
        preferred_element_type=jnp.float32)                  # (B, c_tile) f32

    # One (1, c_tile) class-index iota reused for the positive mask and the
    # padded-column mask (no (B, c_tile) int32 materialization).
    col_idx = (jax.lax.broadcasted_iota(jnp.int32, (1, c_tile), 1)
               + j * c_tile)                                  # (1, c_tile)
    mask = (t == col_idx)                                     # (B, c_tile) bool
    col_valid = col_idx < nb_classes                          # (1, c_tile) bool

    # Single fused exp: select the exponent per entry, exponentiate once.
    arg = jnp.where(mask, -alpha * (cos - mrg), alpha * (cos + mrg))
    e = jnp.exp(arg)                                          # (B, c_tile) f32

    p_sim_sum = jnp.sum(jnp.where(mask, e, 0.0), axis=0, keepdims=True)
    total_sum = jnp.sum(e, axis=0, keepdims=True)
    n_sim_sum = total_sum - p_sim_sum                         # (1, c_tile)

    # Proxies with at least one positive in the batch (exp never underflows to
    # 0 for the positive branch, so p_sim_sum > 0 <=> class has a positive).
    # Padded columns (>= nb_classes) never match a label, so they stay 0.
    has_pos = p_sim_sum > 0.0                                 # (1, c_tile) bool

    # Classes without positives (and padded columns) have p_sim_sum == 0, so
    # log(1 + 0) == 0 and contribute nothing to the positive term.
    pos_part = jnp.sum(jnp.log(1.0 + p_sim_sum))
    neg_part = jnp.sum(jnp.where(col_valid, jnp.log(1.0 + n_sim_sum), 0.0))
    n_valid = jnp.sum(has_pos.astype(jnp.float32))

    out_ref[0, 0] = pos_part
    out_ref[0, 1] = neg_part
    out_ref[0, 2] = n_valid


def proxy_anchor_loss(x, proxies, t, *, mrg=0.1, alpha=32.0, c_tile=1024):
    """x: (B, D), proxies: (C, D), t: (B,) int labels -> scalar f32 loss."""
    B, D = x.shape
    C = proxies.shape[0]

    # Normalize once in f32 (matches torch l2_norm) and stream bf16 operands.
    xn = _l2_normalize(x).astype(jnp.bfloat16)
    pn = _l2_normalize(proxies).astype(jnp.bfloat16)

    # Lane-dense class tile (multiple of 128); shrink until the working-set
    # estimate fits the conservative (v7x-safe) VMEM budget.
    tile = _round_up(min(C, c_tile), 128)
    while tile > 128 and _vmem_estimate(B, D, tile) > _VMEM_BUDGET:
        tile = max(128, _round_up(tile // 2, 128))

    c_pad = _round_up(C, tile)
    if c_pad != C:
        # Pad the bf16 array so the pad fuses with the cast (single XLA pass).
        pn = jnp.pad(pn, ((0, c_pad - C), (0, 0)))
    num_tiles = c_pad // tile

    t2d = t.astype(jnp.int32).reshape(B, 1)

    kernel = functools.partial(
        proxy_anchor_kernel,
        alpha=float(alpha), mrg=float(mrg), nb_classes=C, c_tile=tile,
    )

    vmem_limit = int(min(max(2 * _vmem_estimate(B, D, tile),
                             32 * 1024 * 1024),
                         56 * 1024 * 1024))

    partials = pl.pallas_call(
        kernel,
        out_shape=jax.ShapeDtypeStruct((num_tiles, 3), jnp.float32),
        grid_spec=pltpu.PrefetchScalarGridSpec(
            num_scalar_prefetch=0,
            grid=(num_tiles,),
            in_specs=[
                pl.BlockSpec((B, D), lambda j: (0, 0)),        # X (resident)
                pl.BlockSpec((tile, D), lambda j: (j, 0)),     # proxy tile
                pl.BlockSpec((B, 1), lambda j: (0, 0)),        # labels (resident)
            ],
            out_specs=pl.BlockSpec((1, 3), lambda j: (j, 0),
                                   memory_space=pltpu.MemorySpace.SMEM),
        ),
        compiler_params=pltpu.CompilerParams(
            # Per-tile partials are independent -> both v7x TCs can share the
            # class-tile axis; the tiny final reduction happens in XLA below.
            dimension_semantics=("parallel",),
            vmem_limit_bytes=vmem_limit,
        ),
    )(xn, pn, t2d)

    pos_sum = jnp.sum(partials[:, 0])
    neg_sum = jnp.sum(partials[:, 1])
    n_valid = jnp.sum(partials[:, 2])
    # Matches torch: pos_term / num_valid_proxies + neg_term / nb_classes.
    # (n_valid == 0 yields NaN, same as the torch reference.)
    return pos_sum / n_valid + neg_sum / jnp.float32(C)


def _reference_loss(x, proxies, t, nb_classes, mrg, alpha):
    """Pure-JAX f32 reference mirroring the PyTorch module."""
    xn = _l2_normalize(x)
    pn = _l2_normalize(proxies)
    cos = xn @ pn.T
    one_hot = jax.nn.one_hot(t, nb_classes, dtype=jnp.float32)
    pos_exp = jnp.exp(-alpha * (cos - mrg))
    neg_exp = jnp.exp(alpha * (cos + mrg))
    p_sim = jnp.sum(jnp.where(one_hot == 1.0, pos_exp, 0.0), axis=0)
    n_sim = jnp.sum(jnp.where(one_hot == 0.0, neg_exp, 0.0), axis=0)
    num_valid = jnp.sum((jnp.sum(one_hot, axis=0) != 0).astype(jnp.float32))
    pos_term = jnp.sum(jnp.log(1.0 + p_sim)) / num_valid
    neg_term = jnp.sum(jnp.log(1.0 + n_sim)) / nb_classes
    return pos_term + neg_term


if __name__ == "__main__":
    # Small shapes consistent with the module: nb_classes=16, sz_embed=32, batch=8
    nb_classes = 16
    sz_embed = 32
    batch = 8
    mrg = 0.1
    alpha = 32.0

    key = jax.random.PRNGKey(0)
    k_x, k_p, k_t = jax.random.split(key, 3)

    # Proxies: kaiming_normal_(mode='fan_out') on (nb_classes, sz_embed)
    # => std = sqrt(2 / nb_classes)
    proxies = jax.random.normal(k_p, (nb_classes, sz_embed), dtype=jnp.float32)
    proxies = proxies * jnp.float32(math.sqrt(2.0 / nb_classes))

    x = jax.random.normal(k_x, (batch, sz_embed), dtype=jnp.float32)
    t = jax.random.randint(k_t, (batch,), 0, nb_classes, dtype=jnp.int32)

    loss = proxy_anchor_loss(x, proxies, t, mrg=mrg, alpha=alpha)
    loss = jax.block_until_ready(loss)

    # Sanity check against the f32 reference (loose tolerance: the kernel's
    # cosine matmul uses bf16 inputs, amplified by alpha=32 in the exponent).
    ref = jax.block_until_ready(
        _reference_loss(x, proxies, t, nb_classes, mrg, alpha))
    rel_err = abs(float(loss) - float(ref)) / max(abs(float(ref)), 1e-6)
    assert rel_err < 0.1, f"loss={float(loss)} ref={float(ref)} rel={rel_err}"

    print("KERNEL_OK")
</pallas_src>

<mosaic_0001>
module attributes {stable_mosaic.version = 11 : i64} {
  func.func @proxy_anchor_kernel(%arg0: i32, %arg1: memref<8x32xbf16, #tpu.memory_space<vmem>>, %arg2: memref<128x32xbf16, #tpu.memory_space<vmem>>, %arg3: memref<8x1xi32, #tpu.memory_space<vmem>>, %arg4: memref<1x3xf32, #tpu.memory_space<smem>>) attributes {dimension_semantics = [#tpu.dimension_semantics<parallel>], iteration_bounds = array<i64: 1>, scalar_prefetch = 0 : i64, scratch_operands = 0 : i64, tpu.core_type = #tpu.core_type<tc>, window_params = [{pipeline_mode = #tpu.pipeline_mode<synchronous>, transform_indices = @transform_0, window_bounds = array<i64: 8, 32>}, {transform_indices = @transform_1, window_bounds = array<i64: 128, 32>}, {pipeline_mode = #tpu.pipeline_mode<synchronous>, transform_indices = @transform_2, window_bounds = array<i64: 8, 1>}, {transform_indices = @transform_3, window_bounds = array<i64: 1, 3>}]} {
    %c0 = arith.constant 0 : index
    %c0_0 = arith.constant 0 : index
    %0 = vector.load %arg1[%c0, %c0_0] : memref<8x32xbf16, #tpu.memory_space<vmem>>, vector<8x32xbf16>
    %c0_1 = arith.constant 0 : index
    %c0_2 = arith.constant 0 : index
    %1 = vector.load %arg2[%c0_1, %c0_2] : memref<128x32xbf16, #tpu.memory_space<vmem>>, vector<128x32xbf16>
    %c0_3 = arith.constant 0 : index
    %c0_4 = arith.constant 0 : index
    %2 = vector.load %arg3[%c0_3, %c0_4] : memref<8x1xi32, #tpu.memory_space<vmem>>, vector<8x1xi32>
    %cst = arith.constant dense<0.000000e+00> : vector<8x128xf32>
    %3 = tpu.matmul %0, %1, %cst {dimension_numbers = #tpu.dot_dimension_numbers<[1], [1], [0], [0], [0, 0, 1, 0], [], []>} : vector<8x32xbf16>, vector<128x32xbf16>, vector<8x128xf32> -> vector<8x128xf32>
    %4 = tpu.iota {dimensions = array<i32: 1>} : vector<1x128xi32>
    %c128_i32 = arith.constant 128 : i32
    %5 = arith.muli %arg0, %c128_i32 : i32
    %6 = vector.broadcast %5 : i32 to vector<1x128xi32>
    %7 = arith.addi %4, %6 : vector<1x128xi32>
    %8 = vector.broadcast %2 : vector<8x1xi32> to vector<8x128xi32>
    %9 = vector.broadcast %7 : vector<1x128xi32> to vector<8x128xi32>
    %10 = arith.cmpi eq, %8, %9 : vector<8x128xi32>
    %c16_i32 = arith.constant 16 : i32
    %11 = vector.broadcast %c16_i32 : i32 to vector<1x128xi32>
    %12 = arith.cmpi slt, %7, %11 : vector<1x128xi32>
    %cst_5 = arith.constant 1.000000e-01 : f32
    %13 = vector.broadcast %cst_5 : f32 to vector<8x128xf32>
    %14 = arith.subf %3, %13 : vector<8x128xf32>
    %cst_6 = arith.constant -3.200000e+01 : f32
    %15 = vector.broadcast %cst_6 : f32 to vector<8x128xf32>
    %16 = arith.mulf %15, %14 : vector<8x128xf32>
    %cst_7 = arith.constant 1.000000e-01 : f32
    %17 = vector.broadcast %cst_7 : f32 to vector<8x128xf32>
    %18 = arith.addf %3, %17 : vector<8x128xf32>
    %cst_8 = arith.constant 3.200000e+01 : f32
    %19 = vector.broadcast %cst_8 : f32 to vector<8x128xf32>
    %20 = arith.mulf %19, %18 : vector<8x128xf32>
    %21 = arith.select %10, %16, %20 : vector<8x128xi1>, vector<8x128xf32>
    %22 = math.exp %21 : vector<8x128xf32>
    %cst_9 = arith.constant 0.000000e+00 : f32
    %23 = vector.broadcast %cst_9 : f32 to vector<8x128xf32>
    %24 = arith.select %10, %22, %23 : vector<8x128xi1>, vector<8x128xf32>
    %cst_10 = arith.constant dense<0.000000e+00> : vector<128xf32>
    %25 = vector.multi_reduction <add>, %24, %cst_10 [0] : vector<8x128xf32> to vector<128xf32>
    %26 = vector.shape_cast %25 : vector<128xf32> to vector<1x128xf32>
    %cst_11 = arith.constant dense<0.000000e+00> : vector<128xf32>
    %27 = vector.multi_reduction <add>, %22, %cst_11 [0] : vector<8x128xf32> to vector<128xf32>
    %28 = vector.shape_cast %27 : vector<128xf32> to vector<1x128xf32>
    %29 = arith.subf %28, %26 : vector<1x128xf32>
    %cst_12 = arith.constant 0.000000e+00 : f32
    %30 = vector.broadcast %cst_12 : f32 to vector<1x128xf32>
    %31 = arith.cmpf ogt, %26, %30 : vector<1x128xf32>
    %cst_13 = arith.constant 1.000000e+00 : f32
    %32 = vector.broadcast %cst_13 : f32 to vector<1x128xf32>
    %33 = arith.addf %32, %26 : vector<1x128xf32>
    %34 = math.log %33 : vector<1x128xf32>
    %35 = vector.shape_cast %34 : vector<1x128xf32> to vector<1x1x128xf32>
    %cst_14 = arith.constant dense<0.000000e+00> : vector<1xf32>
    %36 = vector.multi_reduction <add>, %35, %cst_14 [1, 2] : vector<1x1x128xf32> to vector<1xf32>
    %37 = vector.shape_cast %36 : vector<1xf32> to vector<1x1x1xf32>
    %38 = vector.extract %37[0, 0, 0] : f32 from vector<1x1x1xf32>
    %cst_15 = arith.constant 1.000000e+00 : f32
    %39 = vector.broadcast %cst_15 : f32 to vector<1x128xf32>
    %40 = arith.addf %39, %29 : vector<1x128xf32>
    %41 = math.log %40 : vector<1x128xf32>
    %cst_16 = arith.constant 0.000000e+00 : f32
    %42 = vector.broadcast %cst_16 : f32 to vector<1x128xf32>
    %43 = arith.select %12, %41, %42 : vector<1x128xi1>, vector<1x128xf32>
    %44 = vector.shape_cast %43 : vector<1x128xf32> to vector<1x1x128xf32>
    %cst_17 = arith.constant dense<0.000000e+00> : vector<1xf32>
    %45 = vector.multi_reduction <add>, %44, %cst_17 [1, 2] : vector<1x1x128xf32> to vector<1xf32>
    %46 = vector.shape_cast %45 : vector<1xf32> to vector<1x1x1xf32>
    %47 = vector.extract %46[0, 0, 0] : f32 from vector<1x1x1xf32>
    %48 = arith.extui %31 : vector<1x128xi1> to vector<1x128xi32>
    %49 = arith.sitofp %48 : vector<1x128xi32> to vector<1x128xf32>
    %50 = vector.shape_cast %49 : vector<1x128xf32> to vector<1x1x128xf32>
    %cst_18 = arith.constant dense<0.000000e+00> : vector<1xf32>
    %51 = vector.multi_reduction <add>, %50, %cst_18 [1, 2] : vector<1x1x128xf32> to vector<1xf32>
    %52 = vector.shape_cast %51 : vector<1xf32> to vector<1x1x1xf32>
    %53 = vector.extract %52[0, 0, 0] : f32 from vector<1x1x1xf32>
    %c0_19 = arith.constant 0 : index
    %c0_20 = arith.constant 0 : index
    %54 = memref.load %arg4[%c0_19, %c0_20] : memref<1x3xf32, #tpu.memory_space<smem>>
    memref.store %38, %arg4[%c0_19, %c0_20] : memref<1x3xf32, #tpu.memory_space<smem>>
    %c0_21 = arith.constant 0 : index
    %c1 = arith.constant 1 : index
    %55 = memref.load %arg4[%c0_21, %c1] : memref<1x3xf32, #tpu.memory_space<smem>>
    memref.store %47, %arg4[%c0_21, %c1] : memref<1x3xf32, #tpu.memory_space<smem>>
    %c0_22 = arith.constant 0 : index
    %c2 = arith.constant 2 : index
    %56 = memref.load %arg4[%c0_22, %c2] : memref<1x3xf32, #tpu.memory_space<smem>>
    memref.store %53, %arg4[%c0_22, %c2] : memref<1x3xf32, #tpu.memory_space<smem>>
    return
  }
  func.func @transform_0(%arg0: i32) -> (i32, i32) {
    %c0_i32 = arith.constant 0 : i32
    %c0_i32_0 = arith.constant 0 : i32
    %c0_i32_1 = arith.constant 0 : i32
    return %c0_i32, %c0_i32_0 : i32, i32
  }
  func.func @transform_1(%arg0: i32) -> (i32, i32) {
    %c0_i32 = arith.constant 0 : i32
    %c0_i32_0 = arith.constant 0 : i32
    return %arg0, %c0_i32 : i32, i32
  }
  func.func @transform_2(%arg0: i32) -> (i32, i32) {
    %c0_i32 = arith.constant 0 : i32
    %c0_i32_0 = arith.constant 0 : i32
    %c0_i32_1 = arith.constant 0 : i32
    return %c0_i32, %c0_i32_0 : i32, i32
  }
  func.func @transform_3(%arg0: i32) -> (i32, i32) {
    %c0_i32 = arith.constant 0 : i32
    %c0_i32_0 = arith.constant 0 : i32
    return %arg0, %c0_i32 : i32, i32
  }
}

</mosaic_0001>

<bundles_post_ra>
// kernel: tpu_custom_call.1
= control target key start
LH: loop header
LB: loop body
LE: loop exit
PB: predicated region body
PF: predicated region fallthrough
CT: control target
= control target key end

     0   :  { %v308_v1 = vmov 0.0   ;;  %vm74_vm0 = vcmask 261120   ;;  %vm309_vm1 = vmmov 0   ;;  %v310_v6 = vmov 0   ;;  %s384_s0 = inlined_call_operand.vmem [shape: bf16[8,32], index: 0, kind: input, shape index: {}]   ;;  %s385_s1 = inlined_call_operand.vmem [shape: bf16[128,32], index: 1, kind: input, shape index: {}]   ;;  %s386_s2 = inlined_call_operand.vmem [shape: s32[8,1], index: 2, kind: input, shape index: {}]   ;;  %s387_s3 = inlined_call_operand.hbm [shape: f32[1,3], index: 3, kind: output, shape index: {}]  }
   0x1   :  { %v284_v0 = vld [vmem:[%s385_s1 + $0x38] sm:$0xff]   ;;  %253 = vmatprep.subr.bf16.mxu0 %v308_v1  ;;  %v285_v3 = vld [vmem:[%s385_s1 + $0x30] sm:$0xff]   ;;  %v33_v5 = vld [vmem:[%s386_s2] sm:$0xff]  ;;  %269 = vmatprep.mubr.msk.bf16.mxu0 %vm309_vm1, %v308_v1 }
   0x2   :  { %v100_v2 = vsel %vm74_vm0, %v284_v0, 0  ;;  %v97_v4 = vsel %vm74_vm0, %v285_v3, 0  ;;  %283 = vset.pattern.permute.xlu0 %v310_v6 }
   0x3   :  { %254 = vmatpush3.bf16.xpose.msra.mxu0 %v100_v2 }
   0x4   :  { %255 = vmatprep.subr.bf16.mxu0 %v308_v1 }
   0x5   :  { %8 = vsyncpa [#allocation3], 0  ;;  %148 = vperm.xlu0 %283, %v33_v5   ;;  %v286_v7 = vld [vmem:[%s385_s1 + $0x28] sm:$0xff]   ;;  %v287_v9 = vld [vmem:[%s385_s1 + $0x20] sm:$0xff]   ;;  %v142_v20 = vlaneseq  ;;  %vm177_vm3 = vcmask 1040384   ;;  %s311_s5 = smov [#allocation2]  }
   0x6   :  { %v94_v8 = vsel %vm74_vm0, %v286_v7, 0  ;;  %v91_v10 = vsel %vm74_vm0, %v287_v9, 0  ;;  %v288_v11 = vld [vmem:[%s385_s1 + $0x18] sm:$0xff]   ;;  %v289_v13 = vld [vmem:[%s385_s1 + $0x10] sm:$0xff]   ;;  %v290_v15 = vld [vmem:[%s385_s1 + $0x8] sm:$0xff]  }
   0x7   :  { %v88_v12 = vsel %vm74_vm0, %v288_v11, 0  ;;  %v85_v14 = vsel %vm74_vm0, %v289_v13, 0  ;;  %v82_v16 = vsel %vm74_vm0, %v290_v15, 0  ;;  %v291_v17 = vld [vmem:[%s385_s1] sm:$0xff]   ;;  %v143_v21 = vand.u32 127, %v142_v20 }
   0x8   :  { %v79_v18 = vsel %vm74_vm0, %v291_v17, 0  ;;  %v16_v19 = vld [vmem:[%s384_s0] sm:$0xf] }
   0x9   :  { %vm151_vm4 = vcmp.lt.s32.totalorder %v143_v21, 16 }
   0xb   :  { %256 = vmatpush3.bf16.xpose.msra.mxu0 %v97_v4 }
   0xc   :  { %257 = vmatprep.subr.bf16.mxu0 %v308_v1 }
  0x13   :  { %258 = vmatpush3.bf16.xpose.msra.mxu0 %v94_v8 }
  0x14   :  { %259 = vmatprep.subr.bf16.mxu0 %v308_v1 }
  0x1b   :  { %260 = vmatpush3.bf16.xpose.msra.mxu0 %v91_v10 }
  0x1c   :  { %261 = vmatprep.subr.bf16.mxu0 %v308_v1 }
  0x23   :  { %262 = vmatpush3.bf16.xpose.msra.mxu0 %v88_v12 }
  0x24   :  { %263 = vmatprep.subr.bf16.mxu0 %v308_v1 }
  0x2b   :  { %264 = vmatpush3.bf16.xpose.msra.mxu0 %v85_v14 }
  0x2c   :  { %265 = vmatprep.subr.bf16.mxu0 %v308_v1 }
  0x33   :  { %266 = vmatpush3.bf16.xpose.msra.mxu0 %v82_v16 }
  0x34   :  { %267 = vmatprep.subr.bf16.mxu0 %v308_v1 }
  0x3b   :  { %268 = vmatpush3.bf16.xpose.msra.mxu0 %v79_v18 }
  0x42   :  { %270 = vmatmul.mubr.msk.bf16.vlgmr.msra.gmra.mxu0 %vm74_vm0, %v16_v19 }
  0x80   :  { %v149_v22 = vpop.permute.xlu0 %148 }
  0x81   :  { %vm150_vm2 = vcmp.eq.s32.totalorder %v149_v22, %v143_v21 }
 0x102   :  { %v136_v23 = vpop.f32.mrf.mxu0 }
 0x103   :  { %v242_v24 = vadd.f32 -0.1, %v136_v23  ;;  %v154_v25 = vadd.f32 0.1, %v136_v23 }
 0x104   :  { %v271_v26 = vpop.f32.mrf.mxu0 }
 0x105   :  { %v153_v27 = vmul.f32 -32.0, %v242_v24  ;;  %v155_v28 = vmul.f32 32.0, %v154_v25 }
 0x106   :  { %v139_v29 = vpop.f32.mrf.mxu0 }
 0x107   :  { %v156_v30 = vsel %vm150_vm2, %v153_v27, %v155_v28 }
 0x108   :  { %v157_v31 = vmul.f32 1.442695, %v156_v30  ;;  %v272_v32 = vpop.f32.mrf.mxu0 }
 0x10a   :  { %292 = vpow2.f32 %v157_v31 }
 0x117   :  { %v293_v33 = vpop.eup %292 }
 0x118   :  { %v159_v34 = vsel %vm150_vm2, %v293_v33, 0.0  ;;  %v166_v35 = vrot.slane %v293_v33, 4 }
 0x119   :  { %v160_v36 = vrot.slane %v159_v34, 4 }
 0x11a   :  { %v167_v37 = vadd.f32 %v293_v33, %v166_v35 }
 0x11b   :  { %v161_v38 = vadd.f32 %v160_v36, %v159_v34 }
 0x11c   :  { %v168_v39 = vrot.slane %v167_v37, 2 }
 0x11d   :  { %v162_v40 = vrot.slane %v161_v38, 2 }
 0x11e   :  { %v169_v41 = vadd.f32 %v168_v39, %v167_v37 }
 0x11f   :  { %v163_v42 = vadd.f32 %v162_v40, %v161_v38 }
 0x120   :  { %v170_v43 = vrot.slane %v169_v41, 1 }
 0x121   :  { %v164_v44 = vrot.slane %v163_v42, 1 }
 0x122   :  { %v171_v45 = vadd.f32 %v170_v43, %v169_v41 }
 0x123   :  { %v165_v46 = vadd.f32 %v164_v44, %v163_v42 }
 0x125   :  { %v174_v47 = vadd.f32 1.0, %v165_v46  ;;  %v172_v48 = vsub.f32 %v171_v45, %v165_v46  ;;  %vm173_vm5 = vcmp.gt.f32.partialorder %v165_v46, 0.0 }
 0x126   :  { %v243_v57 = vsel %vm173_vm5, 1.0, %v308_v1 }
 0x127   :  { %294 = vlog2.f32 %v174_v47  ;;  %v188_v49 = vadd.f32 1.0, %v172_v48  ;;  %v204_v58 = vsel %vm177_vm3, %v243_v57, 0.0 }
 0x129   :  { %296 = vlog2.f32 %v188_v49 }
 0x134   :  { %v295_v50 = vpop.eup %294 }
 0x135   :  { %v176_v51 = vmul.f32 0.6931472, %v295_v50 }
 0x136   :  { %v297_v52 = vpop.eup %296 }
 0x137   :  { %v178_v53 = vsel %vm177_vm3, %v176_v51, 0.0  ;;  %v190_v54 = vmul.f32 0.6931472, %v297_v52 }
 0x138   :  { %179 = vadd.xlane.f32.xlu0 %v178_v53 }
 0x139   :  { %v191_v55 = vsel %vm151_vm4, %v190_v54, 0.0 }
 0x13a   :  { %v192_v56 = vsel %vm177_vm3, %v191_v55, 0.0 }
 0x13b   :  { %193 = vadd.xlane.f32.xlu1 %v192_v56 }
 0x13f   :  { %205 = vadd.xlane.f32.xlu1 %v204_v58 }
 0x1c1   :  { %v180_v59 = vpop.xlane.xlu0 %179 }
 0x1c2   :  { %v181_v60 = vrot.slane %v180_v59, 4 }
 0x1c4   :  { %v182_v61 = vadd.f32 %v181_v60, %v180_v59  ;;  %v194_v62 = vpop.xlane.xlu1 %193 }
 0x1c5   :  { %v195_v63 = vrot.slane %v194_v62, 4 }
 0x1c6   :  { %v183_v0 = vrot.slane %v182_v61, 2 }
 0x1c7   :  { %v196_v2 = vadd.f32 %v195_v63, %v194_v62 }
 0x1c8   :  { %v206_v3 = vpop.xlane.xlu1 %205  ;;  %v184_v4 = vadd.f32 %v183_v0, %v182_v61 }
 0x1c9   :  { %v197_v5 = vrot.slane %v196_v2, 2  ;;  %v207_v6 = vrot.slane %v206_v3, 4 }
 0x1ca   :  { %v185_v7 = vrot.slane %v184_v4, 1 }
 0x1cb   :  { %v208_v8 = vadd.f32 %v207_v6, %v206_v3  ;;  %v198_v9 = vadd.f32 %v197_v5, %v196_v2 }
 0x1cc   :  { %v186_v10 = vadd.f32 %v185_v7, %v184_v4 }
 0x1cd   :  { %v209_v11 = vrot.slane %v208_v8, 2  ;;  %v199_v12 = vrot.slane %v198_v9, 1 }
 0x1ce   :  { %273 = vpush %v186_v10 }
 0x1cf   :  { %v210_v1 = vadd.f32 %v209_v11, %v208_v8  ;;  %v200_v13 = vadd.f32 %v199_v12, %v198_v9 }
 0x1d1   :  { %275 = vpush %v200_v13  ;;  %v211_v14 = vrot.slane %v210_v1, 1 }
 0x1d3   :  { %v212_v15 = vadd.f32 %v211_v14, %v210_v1 }
 0x1d5   :  { %277 = vpush %v212_v15 }
 0x1ff   :  { %s274_s0 = spop %273 }
 0x200   :  { %215 = sst [smem:[#allocation2]] %s274_s0 }
 0x202   :  { %s276_s1 = spop %275 }
 0x203   :  { %217 = sst [smem:[#allocation2 + $0x1]] %s276_s1 }
 0x206   :  { %s278_s4 = spop %277 }
 0x207   :  { %219 = sst [smem:[#allocation2 + $0x2]] %s278_s4 }
 0x208   :  { %227 = dma.smem_to_hbm %s311_s5, 16, %s387_s3, [#allocation3]  }
 0x209   :  { %306 = dma.done.wait [#allocation3], 16  }
 0x20a   :  { %307 = vsyncadd [#allocation3], 4294967280 }
 0x20b   :  { %231 = sfence }
 0x20c   :  { %232 = vsyncpa [#allocation3], 1 }

</bundles_post_ra>
